<compile_context>
chip_gen: v7x
topology: tpu7x:2x2x1
jax: 0.10.0
libtpu: 0.0.40
codegen_flags: <defaults>
</compile_context>

<pallas_src>
import jax
import jax.numpy as jnp
from jax.experimental import pallas as pl
from jax.experimental.pallas import tpu as pltpu

Z = 4
H = 64
OUT = 3
NEG_SLOPE = 0.01       # nn.LeakyReLU() default


def _leaky_relu(x):
    # max(x, slope*x) == leaky_relu for slope < 1; cheaper than where().
    return jnp.maximum(x, NEG_SLOPE * x)


def _round_up(n, m):
    return (n + m - 1) // m * m


def generator_kernel(x_ref, w1_ref, b1_ref, w2_ref, b2_ref, w3_ref, b3_ref,
                     o_ref):
    # Feature-major: x_ref is (Z, tile_b); weights are PyTorch-shaped (out, in);
    # biases are (out, 1) f32 and broadcast along the lane (batch) axis.
    # fc1 + LeakyReLU (f32 accumulation; bias add + activation in f32)
    h = jnp.dot(w1_ref[...], x_ref[...], preferred_element_type=jnp.float32)
    h = _leaky_relu(h + b1_ref[...])
    # fc2 + LeakyReLU
    h = jnp.dot(w2_ref[...], h.astype(w2_ref.dtype),
                preferred_element_type=jnp.float32)
    h = _leaky_relu(h + b2_ref[...])
    # fc3 (exact 3-row output; lane-dense full-width stores)
    o = jnp.dot(w3_ref[...], h.astype(w3_ref.dtype),
                preferred_element_type=jnp.float32)
    o_ref[...] = (o + b3_ref[...]).astype(o_ref.dtype)


def _vmem_limit_bytes(tile_b, compute_itemsize):
    # x block: Z=4 rows sublane-pad to 16 (bf16) / 8 (f32); double-buffered.
    x_rows = 16 if compute_itemsize == 2 else 8
    x_bytes = 2 * x_rows * tile_b * compute_itemsize
    out_bytes = 2 * 8 * tile_b * 4            # (3, tile_b) f32 pads to 8 rows
    inter_bytes = 4 * H * tile_b * 4          # h1/h2 + casts, generous
    weights = 64 * 1024
    est = x_bytes + out_bytes + inter_bytes + weights
    # Keep above v5e's 16 MiB scoped default floor, below v7x physical VMEM.
    return int(min(100 * 2**20, max(16 * 2**20, int(1.5 * est))))


def generator_forward(x, params, *, tile_b=8192, compute_dtype=jnp.bfloat16):
    """x: (B, Z) float32 -> (B, 3) float32."""
    w1, b1, w2, b2, w3, b3 = params
    B = x.shape[0]

    # Feature-major input: (Z, B). Cheap XLA transpose (16 B/row).
    xt = x.T.astype(compute_dtype)

    # MXU operands in compute_dtype; biases f32 (column vectors) so bias-add
    # and LeakyReLU run at full precision on the f32-accumulated results.
    w1d = w1.astype(compute_dtype)
    w2d = w2.astype(compute_dtype)
    w3d = w3.astype(compute_dtype)
    b1f = b1.reshape(H, 1).astype(jnp.float32)
    b2f = b2.reshape(H, 1).astype(jnp.float32)
    b3f = b3.reshape(OUT, 1).astype(jnp.float32)

    # Batch tiling along lanes (multiple of 128; tail padded with zero cols).
    tile_b = max(128, min(tile_b, _round_up(B, 128)))
    tile_b = _round_up(tile_b, 128)
    b_pad = _round_up(B, tile_b)
    if b_pad != B:
        xt = jnp.pad(xt, ((0, 0), (0, b_pad - B)))
    grid = (b_pad // tile_b,)

    def resident(shape):
        # Constant block index -> stays resident in VMEM across grid steps.
        return pl.BlockSpec(shape, lambda i: (0, 0))

    itemsize = jnp.dtype(compute_dtype).itemsize
    flops = 2 * b_pad * (Z * H + H * H + H * OUT)
    bytes_accessed = (
        Z * b_pad * itemsize                                   # x stream
        + sum(a.size * a.dtype.itemsize
              for a in (w1d, b1f, w2d, b2f, w3d, b3f))         # params
        + OUT * b_pad * 4)                                     # exact output

    out_t = pl.pallas_call(
        generator_kernel,
        out_shape=jax.ShapeDtypeStruct((OUT, b_pad), jnp.float32),
        grid=grid,
        in_specs=[
            pl.BlockSpec((Z, tile_b), lambda i: (0, i)),   # x: pipelined tiles
            resident((H, Z)),                              # w1
            resident((H, 1)),                              # b1
            resident((H, H)),                              # w2
            resident((H, 1)),                              # b2
            resident((OUT, H)),                            # w3
            resident((OUT, 1)),                            # b3
        ],
        out_specs=pl.BlockSpec((OUT, tile_b), lambda i: (0, i)),
        compiler_params=pltpu.CompilerParams(
            dimension_semantics=("parallel",),
            vmem_limit_bytes=_vmem_limit_bytes(tile_b, itemsize)),
        cost_estimate=pl.CostEstimate(
            flops=flops, transcendentals=0, bytes_accessed=bytes_accessed),
    )(xt, w1d, b1f, w2d, b2f, w3d, b3f)

    # (OUT, b_pad) -> (B, OUT); the transpose touches only 12 B/row.
    return out_t[:, :B].T


def init_params(key):
    """PyTorch-Linear-style init (uniform +-1/sqrt(fan_in)).

    Weights stored PyTorch-shaped (out_features, in_features); biases (out,).
    """
    k1, k2, k3, k4, k5, k6 = jax.random.split(key, 6)

    def uni(k, shape, fan_in):
        bound = 1.0 / jnp.sqrt(jnp.float32(fan_in))
        return jax.random.uniform(k, shape, jnp.float32, -bound, bound)

    w1 = uni(k1, (H, Z), Z)
    b1 = uni(k2, (H,), Z)
    w2 = uni(k3, (H, H), H)
    b2 = uni(k4, (H,), H)
    w3 = uni(k5, (OUT, H), H)
    b3 = uni(k6, (OUT,), H)
    return (w1, b1, w2, b2, w3, b3)


def reference_forward(x, params):
    w1, b1, w2, b2, w3, b3 = params
    h = jax.nn.leaky_relu(x @ w1.T + b1, NEG_SLOPE)
    h = jax.nn.leaky_relu(h @ w2.T + b2, NEG_SLOPE)
    return h @ w3.T + b3


if __name__ == "__main__":
    key = jax.random.PRNGKey(0)
    kx, kx2, kp = jax.random.split(key, 3)
    params = init_params(kp)

    # --- small batch, single grid step, f32 path (tight tolerance) ---
    B = 16
    x = jax.random.normal(kx, (B, Z), jnp.float32)
    ref = reference_forward(x, params)
    out = jax.block_until_ready(
        generator_forward(x, params, compute_dtype=jnp.float32))
    assert out.shape == (B, OUT), out.shape
    assert jnp.allclose(out, ref, atol=1e-4, rtol=1e-4), \
        float(jnp.max(jnp.abs(out - ref)))

    # --- default bf16 perf path (looser tolerance) ---
    out_bf = jax.block_until_ready(generator_forward(x, params))
    assert out_bf.shape == (B, OUT), out_bf.shape
    assert jnp.allclose(out_bf, ref, atol=5e-2, rtol=5e-2), \
        float(jnp.max(jnp.abs(out_bf - ref)))

    # --- non-multiple batch: exercises multi-step grid + tail padding ---
    B2 = 300
    x2 = jax.random.normal(kx2, (B2, Z), jnp.float32)
    ref2 = reference_forward(x2, params)
    out2 = jax.block_until_ready(
        generator_forward(x2, params, tile_b=128, compute_dtype=jnp.float32))
    assert out2.shape == (B2, OUT), out2.shape
    assert jnp.allclose(out2, ref2, atol=1e-4, rtol=1e-4), \
        float(jnp.max(jnp.abs(out2 - ref2)))

    print("KERNEL_OK")
</pallas_src>

<mosaic_0001>
module attributes {stable_mosaic.version = 11 : i64} {
  func.func @generator_kernel(%arg0: i32, %arg1: memref<4x128xf32, #tpu.memory_space<vmem>>, %arg2: memref<64x4xf32, #tpu.memory_space<vmem>>, %arg3: memref<64x1xf32, #tpu.memory_space<vmem>>, %arg4: memref<64x64xf32, #tpu.memory_space<vmem>>, %arg5: memref<64x1xf32, #tpu.memory_space<vmem>>, %arg6: memref<3x64xf32, #tpu.memory_space<vmem>>, %arg7: memref<3x1xf32, #tpu.memory_space<vmem>>, %arg8: memref<3x128xf32, #tpu.memory_space<vmem>>) attributes {dimension_semantics = [#tpu.dimension_semantics<parallel>], iteration_bounds = array<i64: 1>, scalar_prefetch = 0 : i64, scratch_operands = 0 : i64, tpu.core_type = #tpu.core_type<tc>, window_params = [{transform_indices = @transform_0, window_bounds = array<i64: 4, 128>}, {pipeline_mode = #tpu.pipeline_mode<synchronous>, transform_indices = @transform_1, window_bounds = array<i64: 64, 4>}, {pipeline_mode = #tpu.pipeline_mode<synchronous>, transform_indices = @transform_2, window_bounds = array<i64: 64, 1>}, {pipeline_mode = #tpu.pipeline_mode<synchronous>, transform_indices = @transform_3, window_bounds = array<i64: 64, 64>}, {pipeline_mode = #tpu.pipeline_mode<synchronous>, transform_indices = @transform_4, window_bounds = array<i64: 64, 1>}, {pipeline_mode = #tpu.pipeline_mode<synchronous>, transform_indices = @transform_5, window_bounds = array<i64: 3, 64>}, {pipeline_mode = #tpu.pipeline_mode<synchronous>, transform_indices = @transform_6, window_bounds = array<i64: 3, 1>}, {transform_indices = @transform_7, window_bounds = array<i64: 3, 128>}]} {
    %c0 = arith.constant 0 : index
    %c0_0 = arith.constant 0 : index
    %0 = vector.load %arg2[%c0, %c0_0] : memref<64x4xf32, #tpu.memory_space<vmem>>, vector<64x4xf32>
    %c0_1 = arith.constant 0 : index
    %c0_2 = arith.constant 0 : index
    %1 = vector.load %arg1[%c0_1, %c0_2] : memref<4x128xf32, #tpu.memory_space<vmem>>, vector<4x128xf32>
    %cst = arith.constant dense<0.000000e+00> : vector<64x128xf32>
    %2 = tpu.matmul %0, %1, %cst {dimension_numbers = #tpu.dot_dimension_numbers<[1], [0], [0], [1], [0, 0, 1, 1], [], []>} : vector<64x4xf32>, vector<4x128xf32>, vector<64x128xf32> -> vector<64x128xf32>
    %c0_3 = arith.constant 0 : index
    %c0_4 = arith.constant 0 : index
    %3 = vector.load %arg3[%c0_3, %c0_4] : memref<64x1xf32, #tpu.memory_space<vmem>>, vector<64x1xf32>
    %4 = vector.broadcast %3 : vector<64x1xf32> to vector<64x128xf32>
    %5 = arith.addf %2, %4 : vector<64x128xf32>
    %cst_5 = arith.constant 0.00999999977 : f32
    %6 = vector.broadcast %cst_5 : f32 to vector<64x128xf32>
    %7 = arith.mulf %6, %5 : vector<64x128xf32>
    %8 = arith.maximumf %5, %7 : vector<64x128xf32>
    %c0_6 = arith.constant 0 : index
    %c0_7 = arith.constant 0 : index
    %9 = vector.load %arg4[%c0_6, %c0_7] : memref<64x64xf32, #tpu.memory_space<vmem>>, vector<64x64xf32>
    %cst_8 = arith.constant dense<0.000000e+00> : vector<64x128xf32>
    %10 = tpu.matmul %9, %8, %cst_8 {dimension_numbers = #tpu.dot_dimension_numbers<[1], [0], [0], [1], [0, 0, 1, 1], [], []>} : vector<64x64xf32>, vector<64x128xf32>, vector<64x128xf32> -> vector<64x128xf32>
    %c0_9 = arith.constant 0 : index
    %c0_10 = arith.constant 0 : index
    %11 = vector.load %arg5[%c0_9, %c0_10] : memref<64x1xf32, #tpu.memory_space<vmem>>, vector<64x1xf32>
    %12 = vector.broadcast %11 : vector<64x1xf32> to vector<64x128xf32>
    %13 = arith.addf %10, %12 : vector<64x128xf32>
    %cst_11 = arith.constant 0.00999999977 : f32
    %14 = vector.broadcast %cst_11 : f32 to vector<64x128xf32>
    %15 = arith.mulf %14, %13 : vector<64x128xf32>
    %16 = arith.maximumf %13, %15 : vector<64x128xf32>
    %c0_12 = arith.constant 0 : index
    %c0_13 = arith.constant 0 : index
    %17 = vector.load %arg6[%c0_12, %c0_13] : memref<3x64xf32, #tpu.memory_space<vmem>>, vector<3x64xf32>
    %cst_14 = arith.constant dense<0.000000e+00> : vector<3x128xf32>
    %18 = tpu.matmul %17, %16, %cst_14 {dimension_numbers = #tpu.dot_dimension_numbers<[1], [0], [0], [1], [0, 0, 1, 1], [], []>} : vector<3x64xf32>, vector<64x128xf32>, vector<3x128xf32> -> vector<3x128xf32>
    %c0_15 = arith.constant 0 : index
    %c0_16 = arith.constant 0 : index
    %19 = vector.load %arg7[%c0_15, %c0_16] : memref<3x1xf32, #tpu.memory_space<vmem>>, vector<3x1xf32>
    %20 = vector.broadcast %19 : vector<3x1xf32> to vector<3x128xf32>
    %21 = arith.addf %18, %20 : vector<3x128xf32>
    %c0_17 = arith.constant 0 : index
    %c0_18 = arith.constant 0 : index
    %22 = vector.load %arg8[%c0_17, %c0_18] : memref<3x128xf32, #tpu.memory_space<vmem>>, vector<3x128xf32>
    tpu.vector_store %arg8[%c0_17, %c0_18], %21 {strides = array<i32>} : memref<3x128xf32, #tpu.memory_space<vmem>>, vector<3x128xf32>,
    return
  }
  func.func @transform_0(%arg0: i32) -> (i32, i32) {
    %c0_i32 = arith.constant 0 : i32
    %c0_i32_0 = arith.constant 0 : i32
    return %c0_i32, %arg0 : i32, i32
  }
  func.func @transform_1(%arg0: i32) -> (i32, i32) {
    %c0_i32 = arith.constant 0 : i32
    %c0_i32_0 = arith.constant 0 : i32
    %c0_i32_1 = arith.constant 0 : i32
    return %c0_i32, %c0_i32_0 : i32, i32
  }
  func.func @transform_2(%arg0: i32) -> (i32, i32) {
    %c0_i32 = arith.constant 0 : i32
    %c0_i32_0 = arith.constant 0 : i32
    %c0_i32_1 = arith.constant 0 : i32
    return %c0_i32, %c0_i32_0 : i32, i32
  }
  func.func @transform_3(%arg0: i32) -> (i32, i32) {
    %c0_i32 = arith.constant 0 : i32
    %c0_i32_0 = arith.constant 0 : i32
    %c0_i32_1 = arith.constant 0 : i32
    return %c0_i32, %c0_i32_0 : i32, i32
  }
  func.func @transform_4(%arg0: i32) -> (i32, i32) {
    %c0_i32 = arith.constant 0 : i32
    %c0_i32_0 = arith.constant 0 : i32
    %c0_i32_1 = arith.constant 0 : i32
    return %c0_i32, %c0_i32_0 : i32, i32
  }
  func.func @transform_5(%arg0: i32) -> (i32, i32) {
    %c0_i32 = arith.constant 0 : i32
    %c0_i32_0 = arith.constant 0 : i32
    %c0_i32_1 = arith.constant 0 : i32
    return %c0_i32, %c0_i32_0 : i32, i32
  }
  func.func @transform_6(%arg0: i32) -> (i32, i32) {
    %c0_i32 = arith.constant 0 : i32
    %c0_i32_0 = arith.constant 0 : i32
    %c0_i32_1 = arith.constant 0 : i32
    return %c0_i32, %c0_i32_0 : i32, i32
  }
  func.func @transform_7(%arg0: i32) -> (i32, i32) {
    %c0_i32 = arith.constant 0 : i32
    %c0_i32_0 = arith.constant 0 : i32
    return %c0_i32, %arg0 : i32, i32
  }
}

</mosaic_0001>

<bundles_post_ra>
// kernel: tpu_custom_call.1
= control target key start
LH: loop header
LB: loop body
LE: loop exit
PB: predicated region body
PF: predicated region fallthrough
CT: control target
= control target key end

     0   :  { %vm109_vm0 = vcmask 1043456   ;;  %vm84_vm1 = vcmask 31744   ;;  %v703_v4 = vmov 0   ;;  %s882_s0 = inlined_call_operand.vmem [shape: f32[4,128], index: 0, kind: input, shape index: {}]   ;;  %s883_s1 = inlined_call_operand.vmem [shape: f32[64,4], index: 1, kind: input, shape index: {}]   ;;  %s884_s2 = inlined_call_operand.vmem [shape: f32[64,1], index: 2, kind: input, shape index: {}]   ;;  %s885_s3 = inlined_call_operand.vmem [shape: f32[64,64], index: 3, kind: input, shape index: {}]   ;;  %s886_s4 = inlined_call_operand.vmem [shape: f32[64,1], index: 4, kind: input, shape index: {}]   ;;  %s887_s5 = inlined_call_operand.vmem [shape: f32[3,64], index: 5, kind: input, shape index: {}]   ;;  %s888_s6 = inlined_call_operand.vmem [shape: f32[3,1], index: 6, kind: input, shape index: {}]   ;;  %s889_s7 = inlined_call_operand.hbm [shape: f32[3,128], index: 7, kind: output, shape index: {}]  }
   0x1   :  { %v35_v0 = vld [vmem:[%s882_s0] sm:$0xf]  ;;  %v28_v2 = vld [vmem:[%s883_s1 + $0x8] sm:$0xff]  ;;  %v29_v3 = vld [vmem:[%s883_s1 + $0x10] sm:$0xff]  ;;  %677 = vset.pattern.permute.xlu0 %v703_v4  ;;  %678 = vset.pattern.permute.xlu1 %v703_v4 }
   0x2   :  { %v27_v1 = vld [vmem:[%s883_s1] sm:$0xff]  ;;  %583 = vmatprep.subr.msk.mxu0 %vm109_vm0, %v35_v0  ;;  %v38_v6 = vld [vmem:[%s884_s2 + $0x10] sm:$0xff]  ;;  %v30_v7 = vld [vmem:[%s883_s1 + $0x18] sm:$0xff] }
   0x3   :  { %585 = vmatprep.mubr.msk.f32.mxu0 %vm84_vm1, %v27_v1  ;;  %584 = vmatpush3.msk.msra.mxu0 %vm109_vm0, %v35_v0  ;;  %v36_v5 = vld [vmem:[%s884_s2] sm:$0xff]  ;;  %v37_v9 = vld [vmem:[%s884_s2 + $0x8] sm:$0xff]  ;;  %v39_v10 = vld [vmem:[%s884_s2 + $0x18] sm:$0xff] }
   0x4   :  { %586 = vmatmul.mubr.msk.f32.vlgmr.msra.gmra.mrb[0].mxu0 %vm84_vm1, %v28_v2  ;;  %46 = vperm.xlu0 %677, %v36_v5   ;;  %v31_v8 = vld [vmem:[%s883_s1 + $0x20] sm:$0xff]  ;;  %v32_v11 = vld [vmem:[%s883_s1 + $0x28] sm:$0xff] }
   0x5   :  { %588 = vmatprep.mubr.msk.f32.mxu0 %vm84_vm1, %v29_v3  ;;  %56 = vperm.xlu1 %678, %v38_v6  }
   0x8   :  { %589 = vmatmul.mubr.msk.f32.gmra.mrb[2].mxu0 %vm84_vm1, %v30_v7  ;;  %51 = vperm.xlu0 %677, %v37_v9  }
   0x9   :  { %591 = vmatprep.mubr.msk.f32.mxu0 %vm84_vm1, %v31_v8 }
   0xa   :  { %12 = vsyncpa [#allocation3], 0  ;;  %v33_v12 = vld [vmem:[%s883_s1 + $0x30] sm:$0xff]  ;;  %v40_v13 = vld [vmem:[%s884_s2 + $0x20] sm:$0xff]  ;;  %61 = vperm.xlu1 %678, %v39_v10   ;;  %vm290_vm2 = vcmask 523264   ;;  %vm705_vm3 = vmmov 0  }
   0xb   :  { %v41_v14 = vld [vmem:[%s884_s2 + $0x28] sm:$0xff]  ;;  %v34_v15 = vld [vmem:[%s883_s1 + $0x38] sm:$0xff]  ;;  %v42_v16 = vld [vmem:[%s884_s2 + $0x30] sm:$0xff] }
   0xc   :  { %592 = vmatmul.mubr.msk.f32.gmra.mrb[4].mxu0 %vm84_vm1, %v32_v11  ;;  %66 = vperm.xlu0 %677, %v40_v13   ;;  %v43_v17 = vld [vmem:[%s884_s2 + $0x38] sm:$0xff]  ;;  %v242_v18 = vld [vmem:[%s886_s4] sm:$0xff]  ;;  %v243_v19 = vld [vmem:[%s886_s4 + $0x8] sm:$0xff]  ;;  %s707_s2 = smov [#allocation2]  }
   0xd   :  { %594 = vmatprep.mubr.msk.f32.mxu0 %vm84_vm1, %v33_v12  ;;  %v244_v20 = vld [vmem:[%s886_s4 + $0x10] sm:$0xff]  ;;  %v245_v21 = vld [vmem:[%s886_s4 + $0x18] sm:$0xff]  ;;  %v246_v22 = vld [vmem:[%s886_s4 + $0x20] sm:$0xff]  ;;  %s523_s16 = sshll.u32 %s707_s2, 4  ;;  %s524_s16 = int_to_ptr.vmem [resolvable:$true] %s523_s16 }
   0xe   :  { %71 = vperm.xlu1 %678, %v41_v14   ;;  %v247_v23 = vld [vmem:[%s886_s4 + $0x28] sm:$0xff]  ;;  %v248_v24 = vld [vmem:[%s886_s4 + $0x30] sm:$0xff]  ;;  %v249_v25 = vld [vmem:[%s886_s4 + $0x38] sm:$0xff]  ;;  %s679_s17 = scalar_lea.vmem %s524_s16, 64  ;;  %p684_p1 = scmp.lt.s32.totalorder %s524_s16, %s524_s16 }
   0xf   :  { %v437_v26 = vld [vmem:[%s888_s6] sm:$0x7]  ;;  %v235_v8 = vld [vmem:[%s885_s3 + $0x8] sm:$0xff]  ;;  %v236_v9 = vld [vmem:[%s885_s3 + $0x10] sm:$0xff]  ;;  %p680_p0 = scmp.ne.s32.totalorder %s524_s16, %s679_s17  ;;  %p685_p2 = scmp.lt.s32.totalorder %s679_s17, %s679_s17 }
  0x10   :  { %595 = vmatmul.mubr.msk.f32.gmra.mrb[6].mxu0 %vm84_vm1, %v34_v15  ;;  %76 = vperm.xlu0 %677, %v42_v16   ;;  %v234_v27 = vld [vmem:[%s885_s3] sm:$0xff]  ;;  %v237_v10 = vld [vmem:[%s885_s3 + $0x18] sm:$0xff]  ;;  %v239_v12 = vld [vmem:[%s885_s3 + $0x28] sm:$0xff]  ;;  %v704_v15 = vmov 0.0|0.0   ;;  %v706_v16 = vmov 0.0  }
  0x11   :  { %613 = vmatprep.mubr.msk.f32.mxu1 %vm290_vm2, %v234_v27  ;;  %v238_v11 = vld [vmem:[%s885_s3 + $0x20] sm:$0xff]  ;;  %v240_v13 = vld [vmem:[%s885_s3 + $0x30] sm:$0xff]  ;;  %v241_v14 = vld [vmem:[%s885_s3 + $0x38] sm:$0xff]  ;;  %660 = vmatprep.subr.bf16.mxu0 %v704_v15  ;;  %p686_p3 = por %p685_p2, %p684_p1 }
  0x12   :  { %81 = vperm.xlu1 %678, %v43_v17   ;;  %641 = vmatprep.mubr.msk.f32.mxu0 %vm705_vm3, %v706_v16 }
  0x13   :  { %p687_p4 = pnand %p686_p3, %p680_p0 }
  0x14   :  { %252 = vperm.xlu0 %677, %v242_v18  }
  0x16   :  { %257 = vperm.xlu1 %678, %v243_v19  }
  0x18   :  { %262 = vperm.xlu0 %677, %v244_v20  }
  0x1a   :  { %267 = vperm.xlu1 %678, %v245_v21  }
  0x1c   :  { %272 = vperm.xlu0 %677, %v246_v22  }
  0x1e   :  { %277 = vperm.xlu1 %678, %v247_v23  }
  0x20   :  { %282 = vperm.xlu0 %677, %v248_v24  }
  0x22   :  { %287 = vperm.xlu1 %678, %v249_v25  }
  0x24   :  { %440 = vperm.xlu0 %677, %v437_v26  }
  0x83   :  { %v47_v28 = vpop.permute.xlu0 %46 }
  0x84   :  { %v57_v29 = vpop.permute.xlu1 %56 }
  0x87   :  { %v52_v30 = vpop.permute.xlu0 %51 }
  0x89   :  { %v62_v31 = vpop.permute.xlu1 %61 }
  0x8b   :  { %v67_v45 = vpop.permute.xlu0 %66 }
  0x8d   :  { %v72_v42 = vpop.permute.xlu1 %71 }
  0x8f   :  { %v77_v60 = vpop.permute.xlu0 %76 }
  0x91   :  { %v82_v56 = vpop.permute.xlu1 %81 }
  0x93   :  { %v253_v18 = vpop.permute.xlu0 %252 }
  0x95   :  { %v258_v17 = vpop.permute.xlu1 %257 }
  0x97   :  { %v263_v21 = vpop.permute.xlu0 %262 }
  0x99   :  { %v268_v19 = vpop.permute.xlu1 %267 }
  0xd7   :  { %v587_v32 = vpop.f32.mrb[0].mxu0 }
  0xd8   :  { %v185_v33 = vadd.f32 %v587_v32, %v52_v30  ;;  %v179_v34 = vpop.f32.mrb[1].mxu0 }
  0xd9   :  { %v180_v35 = vadd.f32 %v179_v34, %v47_v28  ;;  %v273_v34 = vpop.permute.xlu0 %272 }
  0xda   :  { %v219_v36 = vmul.f32 0.01, %v185_v33 }
  0xdb   :  { %v218_v37 = vmul.f32 0.01, %v180_v35  ;;  %v590_v38 = vpop.f32.mrb[2].mxu0 }
  0xdc   :  { %v227_v39 = vmax.f32 %v185_v33, %v219_v36  ;;  %v195_v40 = vadd.f32 %v590_v38, %v62_v31  ;;  %v189_v41 = vpop.f32.mrb[3].mxu0  ;;  %v278_v31 = vpop.permute.xlu1 %277 }
  0xdd   :  { %v226_v43 = vmax.f32 %v180_v35, %v218_v37  ;;  %v190_v44 = vadd.f32 %v189_v41, %v57_v29 }
  0xde   :  { %v221_v46 = vmul.f32 0.01, %v195_v40 }
  0xdf   :  { %v220_v47 = vmul.f32 0.01, %v190_v44  ;;  %v593_v48 = vpop.f32.mrb[4].mxu0  ;;  %v644_v49 = vpack.c.bf16 %v227_v39, %v226_v43 }
  0xe0   :  { %v229_v50 = vmax.f32 %v195_v40, %v221_v46  ;;  %v205_v51 = vadd.f32 %v593_v48, %v72_v42  ;;  %v199_v52 = vpop.f32.mrb[5].mxu0 }
  0xe1   :  { %v228_v53 = vmax.f32 %v190_v44, %v220_v47  ;;  %v200_v54 = vadd.f32 %v199_v52, %v67_v45  ;;  %645 = vmatprep.subr.bf16.mxu1 %v644_v49  ;;  %v288_v45 = vpop.permute.xlu1 %287 }
  0xe2   :  { %v223_v55 = vmul.f32 0.01, %v205_v51  ;;  %647 = vmatpush3.bf16.msra.mxu1 %v644_v49  ;;  %v283_v49 = vpop.permute.xlu0 %282 }
  0xe3   :  { %v222_v57 = vmul.f32 0.01, %v200_v54  ;;  %v596_v58 = vpop.f32.mrb[6].mxu0  ;;  %v648_v59 = vpack.c.bf16 %v229_v50, %v228_v53 }
  0xe4   :  { %v231_v61 = vmax.f32 %v205_v51, %v223_v55  ;;  %v215_v62 = vadd.f32 %v596_v58, %v82_v56  ;;  %v209_v63 = vpop.f32.mrb[7].mxu0 }
  0xe5   :  { %v230_v0 = vmax.f32 %v200_v54, %v222_v57  ;;  %v210_v1 = vadd.f32 %v209_v63, %v77_v60  ;;  %649 = vmatprep.subr.bf16.mxu1 %v648_v59 }
  0xe6   :  { %v225_v2 = vmul.f32 0.01, %v215_v62  ;;  %651 = vmatpush3.bf16.msra.mxu1 %v648_v59 }
  0xe7   :  { %v224_v3 = vmul.f32 0.01, %v210_v1  ;;  %v652_v4 = vpack.c.bf16 %v231_v61, %v230_v0  ;;  %v436_v61 = vld [vmem:[%s887_s5] sm:$0x7] }
  0xe8   :  { %v233_v5 = vmax.f32 %v215_v62, %v225_v2  ;;  %v441_v62 = vpop.permute.xlu0 %440 }
  0xe9   :  { %v232_v6 = vmax.f32 %v210_v1, %v224_v3  ;;  %653 = vmatprep.subr.bf16.mxu1 %v652_v4 }
  0xea   :  { %655 = vmatpush3.bf16.msra.mxu1 %v652_v4 }
  0xeb   :  { %v656_v7 = vpack.c.bf16 %v233_v5, %v232_v6 }
  0xed   :  { %657 = vmatprep.subr.bf16.mxu1 %v656_v7 }
  0xee   :  { %659 = vmatpush3.bf16.msra.mxu1 %v656_v7 }
  0xf1   :  { %614 = vmatmul.mubr.msk.f32.vlgmr.msra.gmra.mrb[0].mxu1 %vm290_vm2, %v235_v8 }
  0xf2   :  { %616 = vmatprep.mubr.msk.f32.mxu1 %vm290_vm2, %v236_v9 }
  0xf5   :  { %617 = vmatmul.mubr.msk.f32.gmra.mrb[2].mxu1 %vm290_vm2, %v237_v10 }
  0xf6   :  { %619 = vmatprep.mubr.msk.f32.mxu1 %vm290_vm2, %v238_v11 }
  0xf9   :  { %620 = vmatmul.mubr.msk.f32.gmra.mrb[4].mxu1 %vm290_vm2, %v239_v12 }
  0xfa   :  { %622 = vmatprep.mubr.msk.f32.mxu1 %vm290_vm2, %v240_v13 }
  0xfd   :  { %623 = vmatmul.mubr.msk.f32.gmra.mrb[6].mxu1 %vm290_vm2, %v241_v14 }
 0x1c4   :  { %v615_v20 = vpop.f32.mrb[0].mxu1 }
 0x1c5   :  { %v387_v22 = vadd.f32 %v615_v20, %v258_v17  ;;  %v381_v23 = vpop.f32.mrb[1].mxu1 }
 0x1c6   :  { %v382_v24 = vadd.f32 %v381_v23, %v253_v18 }
 0x1c7   :  { %v421_v25 = vmul.f32 0.01, %v387_v22 }
 0x1c8   :  { %v420_v26 = vmul.f32 0.01, %v382_v24  ;;  %v618_v27 = vpop.f32.mrb[2].mxu1 }
 0x1c9   :  { %v429_v28 = vmax.f32 %v387_v22, %v421_v25  ;;  %v397_v29 = vadd.f32 %v618_v27, %v268_v19  ;;  %v391_v30 = vpop.f32.mrb[3].mxu1 }
 0x1ca   :  { %v428_v32 = vmax.f32 %v382_v24, %v420_v26  ;;  %v392_v33 = vadd.f32 %v391_v30, %v263_v21 }
 0x1cb   :  { %v423_v35 = vmul.f32 0.01, %v397_v29 }
 0x1cc   :  { %v661_v36 = vpack.c.bf16 %v429_v28, %v428_v32  ;;  %v422_v37 = vmul.f32 0.01, %v392_v33  ;;  %v621_v38 = vpop.f32.mrb[4].mxu1 }
 0x1cd   :  { %v431_v39 = vmax.f32 %v397_v29, %v423_v35  ;;  %v407_v40 = vadd.f32 %v621_v38, %v278_v31  ;;  %v401_v41 = vpop.f32.mrb[5].mxu1 }
 0x1ce   :  { %v430_v42 = vmax.f32 %v392_v33, %v422_v37  ;;  %v402_v43 = vadd.f32 %v401_v41, %v273_v34  ;;  %662 = vmatpush3.bf16.msra.mxu0 %v661_v36 }
 0x1cf   :  { %v425_v44 = vmul.f32 0.01, %v407_v40  ;;  %663 = vmatprep.subr.bf16.mxu0 %v704_v15 }
 0x1d0   :  { %v664_v46 = vpack.c.bf16 %v431_v39, %v430_v42  ;;  %v424_v47 = vmul.f32 0.01, %v402_v43  ;;  %v624_v48 = vpop.f32.mrb[6].mxu1 }
 0x1d1   :  { %v433_v50 = vmax.f32 %v407_v40, %v425_v44  ;;  %v417_v51 = vadd.f32 %v624_v48, %v288_v45  ;;  %v411_v52 = vpop.f32.mrb[7].mxu1 }
 0x1d2   :  { %v432_v53 = vmax.f32 %v402_v43, %v424_v47  ;;  %v412_v54 = vadd.f32 %v411_v52, %v283_v49  ;;  %665 = vmatpush3.bf16.msra.mxu0 %v664_v46 }
 0x1d3   :  { %v427_v55 = vmul.f32 0.01, %v417_v51  ;;  %666 = vmatprep.subr.bf16.mxu0 %v704_v15 }
 0x1d4   :  { %v667_v56 = vpack.c.bf16 %v433_v50, %v432_v53  ;;  %v426_v57 = vmul.f32 0.01, %v412_v54 }
 0x1d5   :  { %v435_v58 = vmax.f32 %v417_v51, %v427_v55 }
 0x1d6   :  { %v434_v59 = vmax.f32 %v412_v54, %v426_v57  ;;  %668 = vmatpush3.bf16.msra.mxu0 %v667_v56 }
 0x1d7   :  { %669 = vmatprep.subr.bf16.mxu0 %v704_v15 }
 0x1d8   :  { %v670_v60 = vpack.c.bf16 %v435_v58, %v434_v59 }
 0x1da   :  { %671 = vmatpush3.bf16.msra.mxu0 %v670_v60 }
 0x1dd   :  { %642 = vmatmul.mubr.msk.f32.vlgmr.msra.gmra.mrb[8].mxu0 %vm290_vm2, %v436_v61 }
 0x2b0   :  { %v512_v63 = vpop.f32.mrb[8].mxu0 }
 0x2b1   :  { %v513_v0 = vadd.f32 %v512_v63, %v441_v62  ;;  %v643_v1 = vpop.f32.mrb[9].mxu0 }
 0x2b3   :  { %516 = vst [vmem:[#allocation2] sm:$0x7] %v513_v0 }
 0x2b4   :  { %690 = shalt.err (!%p687_p4)
}
 0x2b5   :  { %s691_s5 = scalar_lea.hbm %s889_s7, 64 }
 0x2b6   :  { %p692_p5 = scmp.ne.s32.totalorder %s889_s7, %s691_s5  ;;  %p695_p6 = scmp.lt.u32.totalorder %s691_s5, %s889_s7 }
 0x2b8   :  { %p697_p7 = pnand %p695_p6, %p692_p5 }
 0x2ba   :  { %700 = shalt.err (!%p697_p7)
}
 0x2bb   :  { %526 = dma.vmem_to_hbm [thread:$0]  %s524_s16, 64, %s889_s7, [#allocation3]  }
 0x2bc   :  { %701 = dma.done.wait [#allocation3], 64  }
 0x2bd   :  { %702 = vsyncadd [#allocation3], 4294967232 }
 0x2be   :  { %530 = vsyncpa [#allocation3], 1 }

</bundles_post_ra>
